<compile_context>
chip_gen: v5e
topology: v5e:2x2
jax: 0.10.0
libtpu: 0.0.40
codegen_flags: <defaults>
</compile_context>

<pallas_src>
from functools import partial

import numpy as np
import jax
import jax.numpy as jnp
from jax.experimental import pallas as pl
from jax.experimental.pallas import tpu as pltpu

N_LEAVES = 16     # depth-4 unary leaf nodes of BasicTreeGen's full binary tree
N_INTERNAL = 14   # binary nodes at depths 3/2/1 (8 + 4 + 2); root handled separately
LANE = 128


def _round_up(x, m):
    return ((x + m - 1) // m) * m


# ------------------------------ kernel --------------------------------------

def _tree_kernel(x_ref, w_ref, b_ref, o_ref):
    """o = a * (x @ W_eff + b_eff), a = prod(x^2-1, axis=1) / sqrt(1000 + a^2)."""
    x = x_ref[...]                                          # (tn, dim) f32

    # a = prod(x**2 - 1, axis=1, keepdims=True)
    # Log-depth pairwise product: widths shrink dim -> dim/2 -> ... -> 1, so at
    # most one narrow temp is live at a time (vs. dim near-empty (tn,1) columns).
    p = x * x - 1.0
    extra = None
    while p.shape[1] > 1:
        w = p.shape[1]
        half = w // 2
        if w % 2:                                           # odd width: carry last col
            last = p[:, w - 1:w]
            extra = last if extra is None else extra * last
        p = p[:, :half] * p[:, half:2 * half]
    a = p if extra is None else p * extra                   # (tn, 1)
    a = a * jax.lax.rsqrt(1000.0 + a * a)                   # EUP rsqrt + one vmul

    # Fully collapsed affine tree: one lane-dense MXU matmul (W_eff is
    # zero-padded to 128 output lanes; padding is free on the MXU and never
    # reaches HBM — we slice back to the true out width before the store).
    res = jnp.dot(x, w_ref[...], preferred_element_type=jnp.float32) + b_ref[...]
    out = o_ref.shape[1]
    o_ref[...] = a * res[:, :out]                           # (tn, out) narrow store


# ------------------------- host-side weight fusion --------------------------

def fuse_params(p):
    """Collapse Linear(dim->med) + 16 leaves + 14 internal nodes + root into one
    affine map (W_eff, b_eff).  Exact in real arithmetic because every modeled
    operator is affine (see module TODO).  Call once per parameter update, not
    per forward pass."""
    # leaf_i(x) = (x @ w_lin + b_lin) @ w_leaf_i + b_leaf_i
    W = [p["w_lin"] @ p["w_leaf"][i] for i in range(N_LEAVES)]                # (dim, med)
    B = [p["b_lin"] @ p["w_leaf"][i] + p["b_leaf"][i:i + 1] for i in range(N_LEAVES)]
    k = 0
    while len(W) > 2:                                       # binary levels: 16->8->4->2
        Wn, Bn = [], []
        for q in range(0, len(W), 2):
            Wn.append((W[q] + W[q + 1]) @ p["w_int"][k])
            Bn.append((B[q] + B[q + 1]) @ p["w_int"][k] + p["b_int"][k:k + 1])
            k += 1
        W, B = Wn, Bn
    w_eff = (W[0] + W[1]) @ p["w_root"]                     # (dim, out)
    b_eff = (B[0] + B[1]) @ p["w_root"] + p["b_root"]       # (1, out)

    out = int(w_eff.shape[1])
    out_mm = _round_up(out, LANE)                           # lane-pad for the MXU only
    if out_mm != out:
        w_eff = jnp.pad(w_eff, ((0, 0), (0, out_mm - out)))
        b_eff = jnp.pad(b_eff, ((0, 0), (0, out_mm - out)))
    return w_eff, b_eff, out


# ------------------------------ wrapper --------------------------------------

@partial(jax.jit, static_argnames=("out", "tn"))
def trainable_tree_forward(x, w_eff, b_eff, *, out, tn=2048):
    N, dim = x.shape

    # Batch tile: big enough to amortize the ~0.35us/step grid overhead, tiny
    # VMEM footprint either way (fits every generation incl. v7x's 64 MiB).
    # Keep >= 2 grid steps when the batch allows it so both v7x TCs get work.
    tn = max(8, min(_round_up(tn, 8), _round_up(N, 8)))
    if _round_up(N, tn) // tn < 2 and N > 8:
        tn = _round_up(pl.cdiv(N, 2), 8)
    n_pad = _round_up(N, tn)
    if n_pad != N:
        x = jnp.pad(x, ((0, n_pad - N), (0, 0)))

    def _full(shape):
        nd = len(shape)
        return pl.BlockSpec(shape, lambda i, _nd=nd: (0,) * _nd)

    y = pl.pallas_call(
        _tree_kernel,
        out_shape=jax.ShapeDtypeStruct((n_pad, out), jnp.float32),   # unpadded lanes
        grid_spec=pltpu.PrefetchScalarGridSpec(
            num_scalar_prefetch=0,
            grid=(n_pad // tn,),
            in_specs=[
                pl.BlockSpec((tn, dim), lambda i: (i, 0)),           # x tile
                _full(w_eff.shape),                                  # (dim, out_mm)
                _full(b_eff.shape),                                  # (1, out_mm)
            ],
            out_specs=pl.BlockSpec((tn, out), lambda i: (i, 0)),
        ),
        compiler_params=pltpu.CompilerParams(
            dimension_semantics=("parallel",)),
    )(x, w_eff, b_eff)

    return y if n_pad == N else y[:N]


# ------------------------------ parameters -----------------------------------

def init_params(key, dim, med, out):
    """kaiming_uniform_ then weight / ||weight||_F, zero bias (LinearGen semantics)."""
    keys = jax.random.split(key, 4)

    def kaiming_unit(k, fan_in, shape):
        bound = float(np.sqrt(6.0 / fan_in))
        w = jax.random.uniform(k, shape, jnp.float32, -bound, bound)
        return w / jnp.linalg.norm(w)

    leaf_keys = jax.random.split(keys[1], N_LEAVES)
    int_keys = jax.random.split(keys[2], N_INTERNAL)
    return dict(
        w_lin=kaiming_unit(keys[0], dim, (dim, med)),
        b_lin=jnp.zeros((1, med), jnp.float32),
        w_leaf=jnp.stack([kaiming_unit(k, med, (med, med)) for k in leaf_keys]),
        b_leaf=jnp.zeros((N_LEAVES, med), jnp.float32),
        w_int=jnp.stack([kaiming_unit(k, med, (med, med)) for k in int_keys]),
        b_int=jnp.zeros((N_INTERNAL, med), jnp.float32),
        w_root=kaiming_unit(keys[3], med, (med, out)),
        b_root=jnp.zeros((1, out), jnp.float32),
    )


def ref_forward(x, p):
    """Pure-JAX node-by-node reference with the original (un-fused) structure."""
    a = jnp.prod(x * x - 1.0, axis=1, keepdims=True)
    a = a / jnp.sqrt(1000.0 + jnp.sum(a * a, axis=1, keepdims=True))
    h = x @ p["w_lin"] + p["b_lin"]
    vals = [h @ p["w_leaf"][i] + p["b_leaf"][i] for i in range(N_LEAVES)]
    k = 0
    while len(vals) > 2:
        nxt = []
        for q in range(0, len(vals), 2):
            nxt.append((vals[q] + vals[q + 1]) @ p["w_int"][k] + p["b_int"][k])
            k += 1
        vals = nxt
    res = (vals[0] + vals[1]) @ p["w_root"] + p["b_root"]
    return a * res


if __name__ == "__main__":
    dim, med, out = 8, 32, 4          # dim, medNum, outNum
    N = 256

    key = jax.random.PRNGKey(0)
    kx, kp = jax.random.split(key)
    x = jax.random.normal(kx, (N, dim), jnp.float32)
    params = init_params(kp, dim, med, out)

    # Hoisted out of the per-call path: recompute only when params change.
    w_eff, b_eff, out_dim = fuse_params(params)

    y = trainable_tree_forward(x, w_eff, b_eff, out=out_dim)
    y = jax.block_until_ready(y)

    y_ref = ref_forward(x, params)
    assert y.shape == (N, out)
    np.testing.assert_allclose(np.asarray(y), np.asarray(y_ref), rtol=2e-4, atol=1e-6)
    print("KERNEL_OK")
</pallas_src>

<mosaic_0001>
module attributes {stable_mosaic.version = 11 : i64} {
  func.func @_tree_kernel(%arg0: i32, %arg1: memref<128x8xf32, #tpu.memory_space<vmem>>, %arg2: memref<8x128xf32, #tpu.memory_space<vmem>>, %arg3: memref<1x128xf32, #tpu.memory_space<vmem>>, %arg4: memref<128x4xf32, #tpu.memory_space<vmem>>) attributes {dimension_semantics = [#tpu.dimension_semantics<parallel>], iteration_bounds = array<i64: 2>, scalar_prefetch = 0 : i64, scratch_operands = 0 : i64, tpu.core_type = #tpu.core_type<tc>, window_params = [{transform_indices = @transform_0, window_bounds = array<i64: 128, 8>}, {pipeline_mode = #tpu.pipeline_mode<synchronous>, transform_indices = @transform_1, window_bounds = array<i64: 8, 128>}, {pipeline_mode = #tpu.pipeline_mode<synchronous>, transform_indices = @transform_2, window_bounds = array<i64: 1, 128>}, {transform_indices = @transform_3, window_bounds = array<i64: 128, 4>}]} {
    %c0 = arith.constant 0 : index
    %c0_0 = arith.constant 0 : index
    %0 = vector.load %arg1[%c0, %c0_0] : memref<128x8xf32, #tpu.memory_space<vmem>>, vector<128x8xf32>
    %1 = arith.mulf %0, %0 : vector<128x8xf32>
    %cst = arith.constant 1.000000e+00 : f32
    %2 = vector.broadcast %cst : f32 to vector<128x8xf32>
    %3 = arith.subf %1, %2 : vector<128x8xf32>
    %4 = vector.extract_strided_slice %3 {offsets = [0, 0], sizes = [128, 4], strides = [1, 1]} : vector<128x8xf32> to vector<128x4xf32>
    %5 = vector.extract_strided_slice %3 {offsets = [0, 4], sizes = [128, 4], strides = [1, 1]} : vector<128x8xf32> to vector<128x4xf32>
    %6 = arith.mulf %4, %5 : vector<128x4xf32>
    %7 = vector.extract_strided_slice %6 {offsets = [0, 0], sizes = [128, 2], strides = [1, 1]} : vector<128x4xf32> to vector<128x2xf32>
    %8 = vector.extract_strided_slice %6 {offsets = [0, 2], sizes = [128, 2], strides = [1, 1]} : vector<128x4xf32> to vector<128x2xf32>
    %9 = arith.mulf %7, %8 : vector<128x2xf32>
    %10 = vector.extract_strided_slice %9 {offsets = [0, 0], sizes = [128, 1], strides = [1, 1]} : vector<128x2xf32> to vector<128x1xf32>
    %11 = vector.extract_strided_slice %9 {offsets = [0, 1], sizes = [128, 1], strides = [1, 1]} : vector<128x2xf32> to vector<128x1xf32>
    %12 = arith.mulf %10, %11 : vector<128x1xf32>
    %13 = arith.mulf %12, %12 : vector<128x1xf32>
    %cst_1 = arith.constant 1.000000e+03 : f32
    %14 = vector.broadcast %cst_1 : f32 to vector<128x1xf32>
    %15 = arith.addf %14, %13 : vector<128x1xf32>
    %16 = math.rsqrt %15 : vector<128x1xf32>
    %17 = arith.mulf %12, %16 : vector<128x1xf32>
    %c0_2 = arith.constant 0 : index
    %c0_3 = arith.constant 0 : index
    %18 = vector.load %arg2[%c0_2, %c0_3] : memref<8x128xf32, #tpu.memory_space<vmem>>, vector<8x128xf32>
    %cst_4 = arith.constant dense<0.000000e+00> : vector<128x128xf32>
    %19 = tpu.matmul %0, %18, %cst_4 {dimension_numbers = #tpu.dot_dimension_numbers<[1], [0], [0], [1], [0, 0, 1, 1], [], []>} : vector<128x8xf32>, vector<8x128xf32>, vector<128x128xf32> -> vector<128x128xf32>
    %c0_5 = arith.constant 0 : index
    %c0_6 = arith.constant 0 : index
    %20 = vector.load %arg3[%c0_5, %c0_6] : memref<1x128xf32, #tpu.memory_space<vmem>>, vector<1x128xf32>
    %21 = vector.broadcast %20 : vector<1x128xf32> to vector<128x128xf32>
    %22 = arith.addf %19, %21 : vector<128x128xf32>
    %23 = vector.extract_strided_slice %22 {offsets = [0, 0], sizes = [128, 4], strides = [1, 1]} : vector<128x128xf32> to vector<128x4xf32>
    %24 = vector.broadcast %17 : vector<128x1xf32> to vector<128x4xf32>
    %25 = arith.mulf %24, %23 : vector<128x4xf32>
    %c0_7 = arith.constant 0 : index
    %c0_8 = arith.constant 0 : index
    %26 = vector.load %arg4[%c0_7, %c0_8] : memref<128x4xf32, #tpu.memory_space<vmem>>, vector<128x4xf32>
    tpu.vector_store %arg4[%c0_7, %c0_8], %25 {strides = array<i32>} : memref<128x4xf32, #tpu.memory_space<vmem>>, vector<128x4xf32>,
    return
  }
  func.func @transform_0(%arg0: i32) -> (i32, i32) {
    %c0_i32 = arith.constant 0 : i32
    %c0_i32_0 = arith.constant 0 : i32
    return %arg0, %c0_i32 : i32, i32
  }
  func.func @transform_1(%arg0: i32) -> (i32, i32) {
    %c0_i32 = arith.constant 0 : i32
    %c0_i32_0 = arith.constant 0 : i32
    %c0_i32_1 = arith.constant 0 : i32
    return %c0_i32, %c0_i32_0 : i32, i32
  }
  func.func @transform_2(%arg0: i32) -> (i32, i32) {
    %c0_i32 = arith.constant 0 : i32
    %c0_i32_0 = arith.constant 0 : i32
    %c0_i32_1 = arith.constant 0 : i32
    return %c0_i32, %c0_i32_0 : i32, i32
  }
  func.func @transform_3(%arg0: i32) -> (i32, i32) {
    %c0_i32 = arith.constant 0 : i32
    %c0_i32_0 = arith.constant 0 : i32
    return %arg0, %c0_i32 : i32, i32
  }
}

</mosaic_0001>

<bundles_post_ra>
// kernel: trainable_tree_forward.1
= control target key start
LH: loop header
LB: loop body
LE: loop exit
PB: predicated region body
PF: predicated region fallthrough
CT: control target
= control target key end

     0   :  { %s1084_s12 = smov 0   ;;  %s1672_s0 = inlined_call_operand.vmem [shape: f32[256,8], index: 0, kind: input, shape index: {}]   ;;  %s1673_s1 = inlined_call_operand.vmem [shape: f32[8,128], index: 1, kind: input, shape index: {}]   ;;  %s1674_s2 = inlined_call_operand.vmem [shape: f32[1,128], index: 2, kind: input, shape index: {}]   ;;  %s1675_s3 = inlined_call_operand.vmem [shape: f32[256,4], index: 3, kind: output, shape index: {}]  }
   0x1 LB: > { %s958_s13 = sadd.s32 4294967295, %s1058_s12   ;;  %p962_p0 = scmp.ge.s32.totalorder %s1058_s12, 1  ;;  %s1058_s12 = sphi %s1084_s12, %s13_s12  }
   0x2   : > { %p138_p1 = scmp.lt.s32.totalorder %s1058_s12, 3 }
   0x4   : > { %p139_p2 = pnand %p962_p0, %p138_p1 }
   0x5   : > { %s963_s14 = sshll.u32 (!%p139_p2), %s958_s13, 4  ;;  %s1060_s19 = smov (!%p139_p2), 124  }
   0x6   : > { %142 = sbr.rel (%p139_p2) target bundleno = 549 (0x225), region = 32  ;;  %p163_p3 = scmp.lt.s32.totalorder (!%p139_p2), %s963_s14, 31 }
   0x7   : > { %s1061_s20 = smov (!%p139_p2), 126   ;;  %s1062_s21 = smov (!%p139_p2), 127  }
   0xb   : > { %s1689_s14 = smov (!%p163_p3, %s963_s14), 31  ;;  %vm675_vm0 = vcmask 64512  }
   0xc   : > { %s964_s15 = sshll.u32 %s1689_s14, 3 }
   0xd   : > { %s1100_s18 = scalar_lea.vmem %s1672_s0, %s964_s15  ;;  %s1621_s28 = scalar_lea.vmem %s1675_s3, %s964_s15 }
   0xe   : > { %v1103_v0 = vld [vmem:[%s1100_s18 + $0x10] sm:$0xff]  ;;  %v1106_v1 = vld [vmem:[%s1100_s18] sm:$0xff]  ;;  %v1116_v5 = vld [vmem:[%s1100_s18 + $0x18] sm:$0xff] }
   0xf   : > { %v192_v2 = vmul.f32 %v1103_v0, %v1103_v0  ;;  %v190_v3 = vmul.f32 %v1106_v1, %v1106_v1  ;;  %v1113_v4 = vld [vmem:[%s1100_s18 + $0x20] sm:$0xff]  ;;  %v1119_v6 = vld [vmem:[%s1100_s18 + $0x8] sm:$0xff]  ;;  %v193_v12 = vmul.f32 %v1116_v5, %v1116_v5  ;;  %v1139_v17 = vld [vmem:[%s1100_s18 + $0x30] sm:$0xff] }
  0x10   : > { %v194_v7 = vmul.f32 %v1113_v4, %v1113_v4  ;;  %v1124_v10 = vld [vmem:[%s1100_s18 + $0x28] sm:$0xff]  ;;  %v191_v13 = vmul.f32 %v1119_v6, %v1119_v6  ;;  %v1142_v18 = vld [vmem:[%s1100_s18 + $0x38] sm:$0xff]  ;;  %v1145_v20 = vld [vmem:[%s1100_s18 + $0x40] sm:$0xff]  ;;  %v196_v21 = vmul.f32 %v1139_v17, %v1139_v17 }
  0x11   : > { %v969_v8 = vadd.f32 -1.0, %v192_v2  ;;  %v967_v9 = vadd.f32 -1.0, %v190_v3  ;;  %v195_v14 = vmul.f32 %v1124_v10, %v1124_v10  ;;  %v970_v15 = vadd.f32 -1.0, %v193_v12  ;;  %v1157_v26 = vld [vmem:[%s1100_s18 + $0x48] sm:$0xff]  ;;  %v1160_v27 = vld [vmem:[%s1100_s18 + $0x50] sm:$0xff]  ;;  %v1163_v29 = vld [vmem:[%s1100_s18 + $0x58] sm:$0xff] }
  0x12   : > { %v1126_v11 = vadd.f32 -1.0, %v194_v7  ;;  %v968_v16 = vadd.f32 -1.0, %v191_v13  ;;  %v197_v22 = vmul.f32 %v1142_v18, %v1142_v18  ;;  %v198_v23 = vmul.f32 %v1145_v20, %v1145_v20  ;;  %v1175_v35 = vld [vmem:[%s1100_s18 + $0x60] sm:$0xff]  ;;  %v1178_v36 = vld [vmem:[%s1100_s18 + $0x68] sm:$0xff]  ;;  %v1181_v38 = vld [vmem:[%s1100_s18 + $0x70] sm:$0xff] }
  0x13   : > { %242 = vrot.lane.b32.xlu1 %v969_v8, %s1060_s19  ;;  %238 = vrot.lane.b32.xlu0 %v967_v9, %s1060_s19  ;;  %v972_v19 = vadd.f32 -1.0, %v195_v14  ;;  %v973_v24 = vadd.f32 -1.0, %v196_v21  ;;  %v199_v30 = vmul.f32 %v1157_v26, %v1157_v26  ;;  %v200_v31 = vmul.f32 %v1160_v27, %v1160_v27  ;;  %v1193_v44 = vld [vmem:[%s1100_s18 + $0x78] sm:$0xff] }
  0x14   : > { %246 = vrot.lane.b32.xlu2 %v1126_v11, %s1060_s19  ;;  %v974_v25 = vadd.f32 -1.0, %v197_v22  ;;  %v975_v28 = vadd.f32 -1.0, %v198_v23  ;;  %v201_v32 = vmul.f32 %v1163_v29, %v1163_v29  ;;  %v202_v39 = vmul.f32 %v1175_v35, %v1175_v35 }
  0x15   : > { %v976_v33 = vadd.f32 -1.0, %v199_v30  ;;  %v977_v34 = vadd.f32 -1.0, %v200_v31  ;;  %v203_v40 = vmul.f32 %v1178_v36, %v1178_v36  ;;  %v204_v41 = vmul.f32 %v1181_v38, %v1181_v38 }
  0x16   : > { %v978_v37 = vadd.f32 -1.0, %v201_v32  ;;  %v979_v42 = vadd.f32 -1.0, %v202_v39  ;;  %v205_v46 = vmul.f32 %v1193_v44, %v1193_v44 }
  0x17   : > { %v980_v43 = vadd.f32 -1.0, %v203_v40  ;;  %v981_v45 = vadd.f32 -1.0, %v204_v41 }
  0x18   : > { %v982_v47 = vadd.f32 -1.0, %v205_v46 }
  0x1b   : > { %244 = vrot.lane.b32.xlu1 %v970_v15, %s1060_s19  ;;  %240 = vrot.lane.b32.xlu0 %v968_v16, %s1060_s19 }
  0x1c   : > { %248 = vrot.lane.b32.xlu2 %v972_v19, %s1060_s19 }
  0x23   : > { %250 = vrot.lane.b32.xlu0 %v973_v24, %s1060_s19  ;;  %252 = vrot.lane.b32.xlu1 %v974_v25, %s1060_s19 }
  0x24   : > { %254 = vrot.lane.b32.xlu2 %v975_v28, %s1060_s19 }
  0x2b   : > { %256 = vrot.lane.b32.xlu0 %v976_v33, %s1060_s19  ;;  %258 = vrot.lane.b32.xlu1 %v977_v34, %s1060_s19 }
  0x2c   : > { %260 = vrot.lane.b32.xlu2 %v978_v37, %s1060_s19 }
  0x33   : > { %262 = vrot.lane.b32.xlu0 %v979_v42, %s1060_s19  ;;  %264 = vrot.lane.b32.xlu1 %v980_v43, %s1060_s19 }
  0x34   : > { %266 = vrot.lane.b32.xlu2 %v981_v45, %s1060_s19 }
  0x3b   : > { %268 = vrot.lane.b32.xlu0 %v982_v47, %s1060_s19 }
  0x6e   : > { %v247_v48 = vpop.permute.xlu2 %246 }
  0x6f   : > { %v290_v2 = vmul.f32 %v1126_v11, %v247_v48  ;;  %v670_v48 = vld [vmem:[%s1673_s1] sm:$0xff] }
  0x70   : > { %739 = vmatpush.msra.mxu0 %v670_v48  ;;  %1001 = vmatpush.msra.mxu1 %v670_v48 }
  0x71   : > { %983 = vmatmul.msk.f32.vlgmr.msra.gmra.mxu0 %vm675_vm0, %v1106_v1  ;;  %987 = vmatmul.msk.f32.vlgmr.msra.gmra.mxu1 %vm675_vm0, %v1113_v4 }
  0x72   : > { %1002 = vmatpush.msra.mxu2 %v670_v48  ;;  %1003 = vmatpush.msra.mxu3 %v670_v48 }
  0x73   : > { %991 = vmatmul.msk.f32.vlgmr.msra.gmra.mxu2 %vm675_vm0, %v1145_v20  ;;  %995 = vmatmul.msk.f32.vlgmr.msra.gmra.mxu3 %vm675_vm0, %v1175_v35 }
  0x76   : > { %v249_v49 = vpop.permute.xlu2 %248 }
  0x77   : > { %v291_v54 = vmul.f32 %v972_v19, %v249_v49 }
  0x79   : > { %984 = vmatmul.msk.f32.gmra.mxu0 %vm675_vm0, %v1119_v6  ;;  %988 = vmatmul.msk.f32.gmra.mxu1 %vm675_vm0, %v1124_v10 }
  0x7b   : > { %992 = vmatmul.msk.f32.gmra.mxu2 %vm675_vm0, %v1157_v26  ;;  %996 = vmatmul.msk.f32.gmra.mxu3 %vm675_vm0, %v1178_v36 }
  0x7e   : > { %v255_v55 = vpop.permute.xlu2 %254 }
  0x7f   : > { %v1206_v60 = vmul.f32 %v975_v28, %v255_v55 }
  0x81   : > { %985 = vmatmul.msk.f32.gmra.mxu0 %vm675_vm0, %v1103_v0  ;;  %989 = vmatmul.msk.f32.gmra.mxu1 %vm675_vm0, %v1139_v17 }
  0x83   : > { %993 = vmatmul.msk.f32.gmra.mxu2 %vm675_vm0, %v1160_v27  ;;  %997 = vmatmul.msk.f32.gmra.mxu3 %vm675_vm0, %v1181_v38  ;;  %v1063_v27 = vmov 0  }
  0x84   : > { %1016 = vset.pattern.permute.xlu0 %v1063_v27  ;;  %1017 = vset.pattern.permute.xlu1 %v1063_v27 }
  0x85   : > { %v243_v50 = vpop.permute.xlu1 %242  ;;  %v239_v51 = vpop.permute.xlu0 %238  ;;  %1018 = vset.pattern.permute.xlu2 %v1063_v27 }
  0x86   : > { %v288_v52 = vmul.f32 %v969_v8, %v243_v50  ;;  %v286_v53 = vmul.f32 %v967_v9, %v239_v51  ;;  %v261_v3 = vpop.permute.xlu2 %260 }
  0x87   : > { %v1216_v7 = vmul.f32 %v978_v37, %v261_v3 }
  0x88   : > { %322 = vrot.lane.b32.xlu0 %v288_v52, %s1061_s20  ;;  %318 = vrot.lane.b32.xlu1 %v286_v53, %s1061_s20 }
  0x89   : > { %986 = vmatmul.msk.f32.gmra.mxu0 %vm675_vm0, %v1116_v5  ;;  %990 = vmatmul.msk.f32.gmra.mxu1 %vm675_vm0, %v1142_v18 }
  0x8b   : > { %994 = vmatmul.msk.f32.gmra.mxu2 %vm675_vm0, %v1163_v29  ;;  %998 = vmatmul.msk.f32.gmra.mxu3 %vm675_vm0, %v1193_v44 }
  0x8d   : > { %v245_v56 = vpop.permute.xlu1 %244  ;;  %v241_v57 = vpop.permute.xlu0 %240 }
  0x8e   : > { %v289_v58 = vmul.f32 %v970_v15, %v245_v56  ;;  %v287_v59 = vmul.f32 %v968_v16, %v241_v57  ;;  %v267_v13 = vpop.permute.xlu2 %266 }
  0x8f   : > { %v1225_v14 = vmul.f32 %v981_v45, %v267_v13 }
  0x90   : > { %328 = vrot.lane.b32.xlu0 %v291_v54, %s1061_s20  ;;  %324 = vrot.lane.b32.xlu1 %v289_v58, %s1061_s20 }
  0x91   : > { %320 = vrot.lane.b32.xlu2 %v287_v59, %s1061_s20 }
  0x95   : > { %v251_v61 = vpop.permute.xlu0 %250  ;;  %v253_v63 = vpop.permute.xlu1 %252 }
  0x96   : > { %v1208_v62 = vmul.f32 %v973_v24, %v251_v61  ;;  %v293_v8 = vmul.f32 %v974_v25, %v253_v63 }
  0x98   : > { %334 = vrot.lane.b32.xlu0 %v1206_v60, %s1061_s20  ;;  %330 = vrot.lane.b32.xlu1 %v1208_v62, %s1061_s20 }
  0x99   : > { %326 = vrot.lane.b32.xlu2 %v290_v2, %s1061_s20 }
  0x9d   : > { %v257_v9 = vpop.permute.xlu0 %256  ;;  %v259_v11 = vpop.permute.xlu1 %258 }
  0x9e   : > { %v1218_v12 = vmul.f32 %v976_v33, %v257_v9  ;;  %v296_v15 = vmul.f32 %v977_v34, %v259_v11 }
  0xa0   : > { %340 = vrot.lane.b32.xlu0 %v1216_v7, %s1061_s20  ;;  %336 = vrot.lane.b32.xlu1 %v1218_v12, %s1061_s20 }
  0xa1   : > { %332 = vrot.lane.b32.xlu2 %v293_v8, %s1061_s20 }
  0xa5   : > { %v263_v16 = vpop.permute.xlu0 %262  ;;  %v265_v21 = vpop.permute.xlu1 %264 }
  0xa6   : > { %v1227_v19 = vmul.f32 %v979_v42, %v263_v16  ;;  %v299_v22 = vmul.f32 %v980_v43, %v265_v21 }
  0xa8   : > { %346 = vrot.lane.b32.xlu0 %v1225_v14, %s1061_s20  ;;  %342 = vrot.lane.b32.xlu1 %v1227_v19, %s1061_s20 }
  0xa9   : > { %338 = vrot.lane.b32.xlu2 %v296_v15, %s1061_s20 }
  0xad   : > { %v269_v23 = vpop.permute.xlu0 %268 }
  0xae   : > { %v1234_v24 = vmul.f32 %v982_v47, %v269_v23 }
  0xb0   : > { %348 = vrot.lane.b32.xlu1 %v1234_v24, %s1061_s20 }
  0xb1   : > { %344 = vrot.lane.b32.xlu2 %v299_v22, %s1061_s20 }
  0xeb   : > { %v321_v25 = vpop.permute.xlu2 %320 }
  0xec   : > { %v1239_v28 = vmul.f32 %v321_v25, %v287_v59 }
  0xee   : > { %400 = vrot.lane.b32.xlu0 %v1239_v28, %s1062_s21 }
  0xf3   : > { %v327_v30 = vpop.permute.xlu2 %326 }
  0xf4   : > { %v1243_v31 = vmul.f32 %v327_v30, %v290_v2 }
  0xf6   : > { %406 = vrot.lane.b32.xlu0 %v1243_v31, %s1062_s21 }
  0xfa   : > { %v319_v32 = vpop.permute.xlu1 %318  ;;  %v323_v33 = vpop.permute.xlu0 %322 }
  0xfb   : > { %v1247_v34 = vmul.f32 %v319_v32, %v286_v53  ;;  %v333_v37 = vpop.permute.xlu2 %332  ;;  %v1249_v39 = vmul.f32 %v323_v33, %v288_v52 }
  0xfc   : > { %v1251_v40 = vmul.f32 %v333_v37, %v293_v8 }
  0xfd   : > { %398 = vrot.lane.b32.xlu2 %v1247_v34, %s1062_s21  ;;  %402 = vrot.lane.b32.xlu1 %v1249_v39, %s1062_s21 }
  0xfe   : > { %412 = vrot.lane.b32.xlu0 %v1251_v40, %s1062_s21 }
 0x102   : > { %v325_v41 = vpop.permute.xlu1 %324  ;;  %v329_v42 = vpop.permute.xlu0 %328 }
 0x103   : > { %v1259_v43 = vmul.f32 %v325_v41, %v289_v58  ;;  %v339_v45 = vpop.permute.xlu2 %338  ;;  %v1261_v46 = vmul.f32 %v329_v42, %v291_v54 }
 0x104   : > { %v1263_v47 = vmul.f32 %v339_v45, %v296_v15 }
 0x105   : > { %404 = vrot.lane.b32.xlu2 %v1259_v43, %s1062_s21  ;;  %408 = vrot.lane.b32.xlu1 %v1261_v46, %s1062_s21 }
 0x106   : > { %418 = vrot.lane.b32.xlu0 %v1263_v47, %s1062_s21 }
 0x10a   : > { %v331_v49 = vpop.permute.xlu1 %330  ;;  %v335_v50 = vpop.permute.xlu0 %334 }
 0x10b   : > { %v345_v51 = vpop.permute.xlu2 %344  ;;  %v372_v52 = vmul.f32 %v331_v49, %v1208_v62  ;;  %v1284_v53 = vmul.f32 %v335_v50, %v1206_v60 }
 0x10c   : > { %v1286_v1 = vmul.f32 %v345_v51, %v299_v22 }
 0x10d   : > { %410 = vrot.lane.b32.xlu2 %v372_v52, %s1062_s21  ;;  %414 = vrot.lane.b32.xlu1 %v1284_v53, %s1062_s21 }
 0x10e   : > { %424 = vrot.lane.b32.xlu0 %v1286_v1, %s1062_s21 }
 0x112   : > { %v337_v4 = vpop.permute.xlu1 %336  ;;  %v341_v20 = vpop.permute.xlu0 %340 }
 0x113   : > { %v1302_v35 = vmul.f32 %v337_v4, %v1218_v12  ;;  %v1305_v54 = vmul.f32 %v341_v20, %v1216_v7 }
 0x115   : > { %416 = vrot.lane.b32.xlu2 %v1302_v35, %s1062_s21  ;;  %420 = vrot.lane.b32.xlu1 %v1305_v54, %s1062_s21 }
 0x11a   : > { %v343_v6 = vpop.permute.xlu1 %342  ;;  %v347_v10 = vpop.permute.xlu0 %346 }
 0x11b   : > { %v1320_v26 = vmul.f32 %v343_v6, %v1227_v19  ;;  %v1323_v36 = vmul.f32 %v347_v10, %v1225_v14 }
 0x11d   : > { %422 = vrot.lane.b32.xlu2 %v1320_v26, %s1062_s21  ;;  %426 = vrot.lane.b32.xlu1 %v1323_v36, %s1062_s21 }
 0x122   : > { %v349_v0 = vpop.permute.xlu1 %348 }
 0x123   : > { %v1338_v17 = vmul.f32 %v349_v0, %v1234_v24 }
 0x125   : > { %428 = vrot.lane.b32.xlu2 %v1338_v17, %s1062_s21 }
 0x157   : > { %v399_v5 = vpop.permute.xlu2 %398 }
 0x158   : > { %v446_v18 = vmul.f32 %v399_v5, %v1247_v34 }
 0x15a   : > { %v462_v38 = vmul.f32 %v446_v18, %v446_v18 }
 0x15c   : > { %v478_v55 = vadd.f32 1000.0, %v462_v38 }
 0x15e   : > { %1020 = vrsqrt.f32 %v478_v55  ;;  %vm500_vm2 = vweird.f32 %v478_v55 }
 0x15f   : > { %v405_v29 = vpop.permute.xlu2 %404 }
 0x160   : > { %v1344_v56 = vmul.f32 %v405_v29, %v1259_v43  ;;  %v401_v44 = vpop.permute.xlu0 %400 }
 0x161   : > { %v1347_v57 = vmul.f32 %v401_v44, %v1239_v28 }
 0x162   : > { %v465_v58 = vmul.f32 %v1344_v56, %v1344_v56 }
 0x163   : > { %v463_v59 = vmul.f32 %v1347_v57, %v1347_v57 }
 0x164   : > { %v1021_v60 = vpop.eup %1020  ;;  %v1353_v61 = vadd.f32 1000.0, %v465_v58 }
 0x165   : > { %v495_v62 = vmul.f32 %v1021_v60, %v478_v55  ;;  %v479_v63 = vadd.f32 1000.0, %v463_v59  ;;  %vm501_vm1 = vweird.f32 %v1021_v60 }
 0x166   : > { %1022 = vrsqrt.f32 %v1353_v61  ;;  %vm502_vm3 = vmor %vm500_vm2, %vm501_vm1  ;;  %vm530_vm8 = vweird.f32 %v1353_v61 }
 0x167   : > { %v496_v2 = vmul.f32 %v1021_v60, %v495_v62  ;;  %1024 = vrsqrt.f32 %v479_v63  ;;  %v411_v3 = vpop.permute.xlu2 %410  ;;  %vm510_vm5 = vweird.f32 %v479_v63 }
 0x168   : > { %v1356_v7 = vmul.f32 %v411_v3, %v372_v52  ;;  %v407_v8 = vpop.permute.xlu0 %406 }
 0x169   : > { %v497_v9 = vmul.f32 0.5, %v496_v2  ;;  %v1359_v12 = vmul.f32 %v407_v8, %v1243_v31 }
 0x16a   : > { %v468_v11 = vmul.f32 %v1356_v7, %v1356_v7 }
 0x16b   : > { %v498_v13 = vsub.f32 1.5, %v497_v9  ;;  %v466_v14 = vmul.f32 %v1359_v12, %v1359_v12 }
 0x16c   : > { %v1365_v15 = vpop.eup %1022  ;;  %v1367_v16 = vadd.f32 1000.0, %v468_v11 }
 0x16d   : > { %v1025_v19 = vpop.eup %1024  ;;  %v499_v21 = vmul.f32 %v1021_v60, %v498_v13  ;;  %v525_v22 = vmul.f32 %v1365_v15, %v1353_v61  ;;  %v1371_v23 = vadd.f32 1000.0, %v466_v14  ;;  %vm531_vm7 = vweird.f32 %v1365_v15 }
 0x16e   : > { %v505_v24 = vmul.f32 %v1025_v19, %v479_v63  ;;  %1026 = vrsqrt.f32 %v1367_v16  ;;  %vm511_vm4 = vweird.f32 %v1025_v19  ;;  %vm532_vm9 = vmor %vm530_vm8, %vm531_vm7  ;;  %vm560_vm11 = vweird.f32 %v1367_v16 }
 0x16f   : > { %v503_v25 = vsel %vm502_vm3, %v1021_v60, %v499_v21  ;;  %v526_v28 = vmul.f32 %v1365_v15, %v525_v22  ;;  %1028 = vrsqrt.f32 %v1371_v23  ;;  %v417_v30 = vpop.permute.xlu2 %416  ;;  %v403_v31 = vpop.permute.xlu1 %402  ;;  %vm512_vm6 = vmor %vm510_vm5, %vm511_vm4  ;;  %vm540_vm2 = vweird.f32 %v1371_v23 }
 0x170   : > { %v654_v32 = vmul.f32 %v503_v25, %v446_v18  ;;  %v506_v33 = vmul.f32 %v1025_v19, %v505_v24  ;;  %v1377_v34 = vmul.f32 %v417_v30, %v1302_v35  ;;  %v1380_v37 = vmul.f32 %v403_v31, %v1249_v39  ;;  %v413_v41 = vpop.permute.xlu0 %412 }
 0x171   : > { %v1383_v42 = vmul.f32 %v413_v41, %v1251_v40  ;;  %v527_v43 = vmul.f32 0.5, %v526_v28 }
 0x172   : > { %v507_v45 = vmul.f32 0.5, %v506_v33  ;;  %v471_v48 = vmul.f32 %v1377_v34, %v1377_v34  ;;  %v464_v49 = vmul.f32 %v1380_v37, %v1380_v37  ;;  %791 = vperm.xlu0 %1016, %v654_v32  }
 0x173   : > { %v469_v50 = vmul.f32 %v1383_v42, %v1383_v42  ;;  %v528_v6 = vsub.f32 1.5, %v527_v43 }
 0x174   : > { %v1391_v51 = vpop.eup %1026  ;;  %v508_v39 = vsub.f32 1.5, %v507_v45  ;;  %v1393_v52 = vadd.f32 1000.0, %v471_v48  ;;  %v1395_v40 = vadd.f32 1000.0, %v464_v49 }
 0x175   : > { %v1397_v4 = vpop.eup %1028  ;;  %v555_v20 = vmul.f32 %v1391_v51, %v1367_v16  ;;  %v1401_v35 = vadd.f32 1000.0, %v469_v50  ;;  %v529_v58 = vmul.f32 %v1365_v15, %v528_v6  ;;  %vm561_vm10 = vweird.f32 %v1391_v51 }
 0x176   : > { %v509_v10 = vmul.f32 %v1025_v19, %v508_v39  ;;  %1030 = vrsqrt.f32 %v1393_v52  ;;  %v535_v44 = vmul.f32 %v1397_v4, %v1371_v23  ;;  %vm1463_vm13 = vmor %vm560_vm11, %vm561_vm10  ;;  %vm520_vm14 = vweird.f32 %v1395_v40 }
 0x177   : > { %v556_v0 = vmul.f32 %v1391_v51, %v555_v20  ;;  %1032 = vrsqrt.f32 %v1395_v40  ;;  %v423_v27 = vpop.permute.xlu2 %422  ;;  %v409_v5 = vpop.permute.xlu1 %408  ;;  %v533_v61 = vsel %vm532_vm9, %v1365_v15, %v529_v58  ;;  %vm541_vm15 = vweird.f32 %v1397_v4 }
 0x178   : > { %v513_v18 = vsel %vm512_vm6, %v1025_v19, %v509_v10  ;;  %v419_v38 = vpop.permute.xlu0 %418  ;;  %1034 = vrsqrt.f32 %v1401_v35  ;;  %v1413_v59 = vmul.f32 %v423_v27, %v1320_v26  ;;  %v1416_v60 = vmul.f32 %v409_v5, %v1261_v46  ;;  %vm1504_vm3 = vmor %vm540_vm2, %vm541_vm15 }
 0x179   : > { %v655_v55 = vmul.f32 %v513_v18, %v1347_v57  ;;  %v557_v29 = vmul.f32 0.5, %v556_v0  ;;  %v1419_v62 = vmul.f32 %v419_v38, %v1263_v47  ;;  %v536_v47 = vmul.f32 %v1397_v4, %v535_v44 }
 0x17a   : > { %v474_v57 = vmul.f32 %v1413_v59, %v1413_v59  ;;  %v467_v2 = vmul.f32 %v1416_v60, %v1416_v60  ;;  %v657_v25 = vmul.f32 %v533_v61, %v1344_v56  ;;  %vm590_vm4 = vweird.f32 %v1393_v52 }
 0x17b   : > { %796 = vperm.xlu1 %1017, %v655_v55   ;;  %v472_v26 = vmul.f32 %v1419_v62, %v1419_v62  ;;  %v558_v46 = vsub.f32 1.5, %v557_v29  ;;  %v537_v28 = vmul.f32 0.5, %v536_v47  ;;  %vm570_vm11 = vweird.f32 %v1401_v35 }
 0x17c   : > { %v1421_v63 = vpop.eup %1030  ;;  %v1437_v11 = vadd.f32 1000.0, %v474_v57  ;;  %v1442_v19 = vadd.f32 1000.0, %v467_v2 }
 0x17d   : > { %v1033_v3 = vpop.eup %1032  ;;  %v585_v8 = vmul.f32 %v1421_v63, %v1393_v52  ;;  %v1444_v21 = vadd.f32 1000.0, %v472_v26  ;;  %v559_v15 = vmul.f32 %v1391_v51, %v558_v46  ;;  %v538_v49 = vsub.f32 1.5, %v537_v28 }
 0x17e   : > { %v515_v9 = vmul.f32 %v1033_v3, %v1395_v40  ;;  %v1439_v13 = vpop.eup %1034  ;;  %1036 = vrsqrt.f32 %v1437_v11  ;;  %vm521_vm12 = vweird.f32 %v1033_v3  ;;  %vm591_vm1 = vweird.f32 %v1421_v63 }
 0x17f   : > { %v586_v14 = vmul.f32 %v1421_v63, %v585_v8  ;;  %v415_v22 = vpop.permute.xlu1 %414  ;;  %v429_v30 = vpop.permute.xlu2 %428  ;;  %v565_v33 = vmul.f32 %v1439_v13, %v1401_v35  ;;  %1038 = vrsqrt.f32 %v1442_v19  ;;  %vm522_vm0 = vmor %vm520_vm14, %vm521_vm12  ;;  %v539_v38 = vmul.f32 %v1397_v4, %v538_v49 }
 0x180   : > { %v516_v24 = vmul.f32 %v1033_v3, %v515_v9  ;;  %v425_v41 = vpop.permute.xlu0 %424  ;;  %1040 = vrsqrt.f32 %v1444_v21  ;;  %v1456_v43 = vmul.f32 %v429_v30, %v1338_v17  ;;  %v1459_v45 = vmul.f32 %v415_v22, %v1284_v53  ;;  %vm1519_vm5 = vmor %vm590_vm4, %vm591_vm1 }
 0x181   : > { %v587_v31 = vmul.f32 0.5, %v586_v14  ;;  %v1469_v16 = vmul.f32 %v425_v41, %v1286_v1  ;;  %v563_v17 = vsel %vm1463_vm13, %v1391_v51, %v559_v15  ;;  %v566_v53 = vmul.f32 %v1439_v13, %v565_v33 }
 0x182   : > { %v517_v32 = vmul.f32 0.5, %v516_v24  ;;  %v477_v6 = vmul.f32 %v1456_v43, %v1456_v43  ;;  %v470_v1 = vmul.f32 %v1459_v45, %v1459_v45  ;;  %v660_v18 = vmul.f32 %v563_v17, %v1356_v7 }
 0x183   : > { %806 = vperm.xlu1 %1017, %v657_v25   ;;  %v588_v50 = vsub.f32 1.5, %v587_v31  ;;  %v475_v27 = vmul.f32 %v1469_v16, %v1469_v16  ;;  %v567_v58 = vmul.f32 0.5, %v566_v53  ;;  %v543_v8 = vsel %vm1504_vm3, %v1397_v4, %v539_v38 }
 0x184   : > { %v518_v56 = vsub.f32 1.5, %v517_v32  ;;  %v1475_v20 = vpop.eup %1036  ;;  %v1500_v7 = vadd.f32 1000.0, %v470_v1  ;;  %v658_v15 = vmul.f32 %v543_v8, %v1359_v12  ;;  %vm571_vm7 = vweird.f32 %v1439_v13 }
 0x185   : > { %v1039_v10 = vpop.eup %1038  ;;  %v615_v0 = vmul.f32 %v1475_v20, %v1437_v11  ;;  %v589_v44 = vmul.f32 %v1421_v63, %v588_v50  ;;  %v1509_v47 = vadd.f32 1000.0, %v475_v27  ;;  %v568_v52 = vsub.f32 1.5, %v567_v58  ;;  %vm1551_vm12 = vmor %vm570_vm11, %vm571_vm7 }
 0x186   : > { %v519_v39 = vmul.f32 %v1033_v3, %v518_v56  ;;  %v1487_v5 = vpop.eup %1040  ;;  %v545_v29 = vmul.f32 %v1039_v10, %v1442_v19  ;;  %vm551_vm6 = vweird.f32 %v1039_v10  ;;  %vm550_vm8 = vweird.f32 %v1442_v19 }
 0x187   : > { %v421_v40 = vpop.permute.xlu1 %420  ;;  %v616_v57 = vmul.f32 %v1475_v20, %v615_v0  ;;  %v595_v2 = vmul.f32 %v1487_v5, %v1444_v21  ;;  %v569_v33 = vmul.f32 %v1439_v13, %v568_v52  ;;  %vm621_vm9 = vweird.f32 %v1475_v20  ;;  %vm552_vm10 = vmor %vm550_vm8, %vm551_vm6 }
 0x188   : > { %v523_v51 = vsel %vm522_vm0, %v1033_v3, %v519_v39  ;;  %v546_v26 = vmul.f32 %v1039_v10, %v545_v29  ;;  %v1498_v3 = vadd.f32 1000.0, %v477_v6  ;;  %v1512_v23 = vmul.f32 %v421_v40, %v1305_v54 }
 0x189   : > { %v656_v55 = vmul.f32 %v523_v51, %v1380_v37  ;;  %v617_v46 = vmul.f32 0.5, %v616_v57  ;;  %v596_v14 = vmul.f32 %v1487_v5, %v595_v2  ;;  %v593_v54 = vsel %vm1519_vm5, %v1421_v63, %v589_v44 }
 0x18a   : > { %v547_v9 = vmul.f32 0.5, %v546_v26  ;;  %1042 = vrsqrt.f32 %v1498_v3  ;;  %v473_v24 = vmul.f32 %v1512_v23, %v1512_v23  ;;  %v663_v28 = vmul.f32 %v593_v54, %v1377_v34 }
 0x18b   : > { %801 = vperm.xlu2 %1018, %v656_v55   ;;  %821 = vperm.xlu1 %1017, %v660_v18   ;;  %v618_v22 = vsub.f32 1.5, %v617_v46  ;;  %1044 = vrsqrt.f32 %v1500_v7  ;;  %v597_v31 = vmul.f32 0.5, %v596_v14  ;;  %vm620_vm13 = vweird.f32 %v1437_v11 }
 0x18c   : > { %v548_v4 = vsub.f32 1.5, %v547_v9  ;;  %1046 = vrsqrt.f32 %v1509_v47  ;;  %v1539_v32 = vadd.f32 1000.0, %v473_v24  ;;  %vm1562_vm14 = vmor %vm620_vm13, %vm621_vm9  ;;  %v573_v11 = vsel %vm1551_vm12, %v1439_v13, %v569_v33 }
 0x18d   : > { %v619_v41 = vmul.f32 %v1475_v20, %v618_v22  ;;  %v598_v50 = vsub.f32 1.5, %v597_v31  ;;  %vm601_vm15 = vweird.f32 %v1487_v5  ;;  %v661_v13 = vmul.f32 %v573_v11, %v1383_v42 }
 0x18e   : > { %v549_v30 = vmul.f32 %v1039_v10, %v548_v4  ;;  %1048 = vrsqrt.f32 %v1539_v32  ;;  %vm600_vm1 = vweird.f32 %v1444_v21  ;;  %vm650_vm4 = vweird.f32 %v1498_v3 }
 0x18f   : > { %v427_v25 = vpop.permute.xlu1 %426  ;;  %vm1587_vm3 = vmor %vm600_vm1, %vm601_vm15  ;;  %vm580_vm6 = vweird.f32 %v1500_v7  ;;  %vm610_vm9 = vweird.f32 %v1539_v32  ;;  %vm630_vm12 = vweird.f32 %v1509_v47  ;;  %vm885_vm1 = vcmask 31744  }
 0x190   : > { %v1536_v63 = vmul.f32 %v427_v25, %v1323_v36  ;;  %v1043_v19 = vpop.eup %1042  ;;  %v553_v36 = vsel %vm552_vm10, %v1039_v10, %v549_v30  ;;  %v753_v30 = vpop.f32.mrf.mxu1 }
 0x191   : > { %v1045_v34 = vpop.eup %1044  ;;  %v659_v48 = vmul.f32 %v553_v36, %v1416_v60  ;;  %v645_v49 = vmul.f32 %v1043_v19, %v1498_v3  ;;  %v623_v60 = vsel %vm1562_vm14, %v1475_v20, %v619_v41  ;;  %v599_v20 = vmul.f32 %v1487_v5, %v598_v50 }
 0x192   : > { %v476_v12 = vmul.f32 %v1536_v63, %v1536_v63  ;;  %v1558_v17 = vpop.eup %1046  ;;  %v575_v39 = vmul.f32 %v1045_v34, %v1500_v7  ;;  %v666_v27 = vmul.f32 %v623_v60, %v1413_v59  ;;  %vm651_vm0 = vweird.f32 %v1043_v19 }
 0x193   : > { %836 = vperm.xlu1 %1017, %v663_v28   ;;  %811 = vperm.xlu2 %1018, %v658_v15   ;;  %v646_v6 = vmul.f32 %v1043_v19, %v645_v49  ;;  %v625_v1 = vmul.f32 %v1558_v17, %v1509_v47  ;;  %vm581_vm2 = vweird.f32 %v1045_v34  ;;  %v603_v2 = vsel %vm1587_vm3, %v1487_v5, %v599_v20  ;;  %vm652_vm5 = vmor %vm650_vm4, %vm651_vm0  ;;  %v741_v28 = vpop.f32.mrf.mxu0 }
 0x194   : > { %v1567_v53 = vadd.f32 1000.0, %v476_v12  ;;  %816 = vperm.xlu0 %1016, %v659_v48   ;;  %v576_v40 = vmul.f32 %v1045_v34, %v575_v39  ;;  %v1049_v0 = vpop.eup %1048  ;;  %vm582_vm7 = vmor %vm580_vm6, %vm581_vm2  ;;  %v664_v54 = vmul.f32 %v603_v2, %v1419_v62  ;;  %vm631_vm10 = vweird.f32 %v1558_v17  ;;  %v765_v12 = vpop.f32.mrf.mxu2 }
 0x195   : > { %v647_v10 = vmul.f32 0.5, %v646_v6  ;;  %v626_v51 = vmul.f32 %v1558_v17, %v625_v1  ;;  %v605_v29 = vmul.f32 %v1049_v0, %v1539_v32  ;;  %vm611_vm8 = vweird.f32 %v1049_v0  ;;  %vm632_vm13 = vmor %vm630_vm12, %vm631_vm10  ;;  %v777_v6 = vpop.f32.mrf.mxu3 }
 0x196   : > { %1050 = vrsqrt.f32 %v1567_v53  ;;  %v577_v18 = vmul.f32 0.5, %v576_v40  ;;  %vm612_vm11 = vmor %vm610_vm9, %vm611_vm8  ;;  %vm640_vm15 = vweird.f32 %v1567_v53 }
 0x197   : > { %v648_v38 = vsub.f32 1.5, %v647_v10  ;;  %v627_v55 = vmul.f32 0.5, %v626_v51  ;;  %v606_v58 = vmul.f32 %v1049_v0, %v605_v29 }
 0x198   : > { %v578_v44 = vsub.f32 1.5, %v577_v18  ;;  %v756_v32 = vpop.f32.mrf.mxu1 }
 0x199   : > { %v649_v59 = vmul.f32 %v1043_v19, %v648_v38  ;;  %v628_v37 = vsub.f32 1.5, %v627_v55  ;;  %v607_v46 = vmul.f32 0.5, %v606_v58 }
 0x19a   : > { %v579_v21 = vmul.f32 %v1045_v34, %v578_v44 }
 0x19b   : > { %851 = vperm.xlu1 %1017, %v666_v27   ;;  %826 = vperm.xlu2 %1018, %v661_v13   ;;  %v653_v26 = vsel %vm652_vm5, %v1043_v19, %v649_v59  ;;  %v608_v3 = vsub.f32 1.5, %v607_v46  ;;  %v629_v7 = vmul.f32 %v1558_v17, %v628_v37  ;;  %v744_v31 = vpop.f32.mrf.mxu0 }
 0x19c   : > { %v1051_v57 = vpop.eup %1050  ;;  %v583_v61 = vsel %vm582_vm7, %v1045_v34, %v579_v21  ;;  %v669_v5 = vmul.f32 %v653_v26, %v1456_v43 }
 0x19d   : > { %v635_v8 = vmul.f32 %v1051_v57, %v1567_v53  ;;  %v662_v9 = vmul.f32 %v583_v61, %v1459_v45  ;;  %v609_v52 = vmul.f32 %v1049_v0, %v608_v3  ;;  %v633_v62 = vsel %vm632_vm13, %v1558_v17, %v629_v7  ;;  %v768_v17 = vpop.f32.mrf.mxu2  ;;  %v780_v38 = vpop.f32.mrf.mxu3 }
 0x19e   : > { %vm641_vm14 = vweird.f32 %v1051_v57  ;;  %v667_v25 = vmul.f32 %v633_v62, %v1469_v16 }
 0x19f   : > { %v636_v14 = vmul.f32 %v1051_v57, %v635_v8  ;;  %831 = vperm.xlu0 %1016, %v662_v9   ;;  %v613_v45 = vsel %vm612_vm11, %v1049_v0, %v609_v52  ;;  %vm642_vm0 = vmor %vm640_vm15, %vm641_vm14 }
 0x1a0   : > { %v665_v43 = vmul.f32 %v613_v45, %v1512_v23  ;;  %v1612_v23 = vld [vmem:[%s1674_s2] ss:$0 sm:$0xff]  ;;  %v759_v34 = vpop.f32.mrf.mxu1 }
 0x1a1   : > { %v637_v22 = vmul.f32 0.5, %v636_v14  ;;  %v742_v33 = vadd.f32 %v1612_v23, %v741_v28  ;;  %v745_v48 = vadd.f32 %v1612_v23, %v744_v31  ;;  %v754_v49 = vadd.f32 %v1612_v23, %v753_v30 }
 0x1a2   : > { %v760_v20 = vadd.f32 %v1612_v23, %v759_v34  ;;  %v769_v59 = vadd.f32 %v1612_v23, %v768_v17  ;;  %v781_v58 = vadd.f32 %v1612_v23, %v780_v38  ;;  %v757_v2 = vadd.f32 %v1612_v23, %v756_v32 }
 0x1a3   : > { %866 = vperm.xlu1 %1017, %v669_v5   ;;  %841 = vperm.xlu2 %1018, %v664_v54   ;;  %v638_v4 = vsub.f32 1.5, %v637_v22  ;;  %v747_v16 = vpop.f32.mrf.mxu0  ;;  %v778_v9 = vadd.f32 %v1612_v23, %v777_v6  ;;  %v766_v7 = vadd.f32 %v1612_v23, %v765_v12 }
 0x1a4   : > { %v748_v41 = vadd.f32 %v1612_v23, %v747_v16 }
 0x1a5   : > { %v639_v24 = vmul.f32 %v1051_v57, %v638_v4  ;;  %v771_v27 = vpop.f32.mrf.mxu2 }
 0x1a6   : > { %v772_v18 = vadd.f32 %v1612_v23, %v771_v27 }
 0x1a7   : > { %846 = vperm.xlu0 %1016, %v665_v43   ;;  %v643_v15 = vsel %vm642_vm0, %v1051_v57, %v639_v24  ;;  %v783_v57 = vpop.f32.mrf.mxu3 }
 0x1a8   : > { %v668_v47 = vmul.f32 %v643_v15, %v1536_v63  ;;  %v762_v60 = vpop.f32.mrf.mxu1  ;;  %v784_v15 = vadd.f32 %v1612_v23, %v783_v57 }
 0x1a9   : > { %v763_v40 = vadd.f32 %v1612_v23, %v762_v60 }
 0x1ab   : > { %856 = vperm.xlu2 %1018, %v667_v25   ;;  %v750_v11 = vpop.f32.mrf.mxu0 }
 0x1ac   : > { %v751_v1 = vadd.f32 %v1612_v23, %v750_v11 }
 0x1ad   : > { %v774_v4 = vpop.f32.mrf.mxu2 }
 0x1ae   : > { %v775_v43 = vadd.f32 %v1612_v23, %v774_v4 }
 0x1af   : > { %861 = vperm.xlu0 %1016, %v668_v47   ;;  %v786_v54 = vpop.f32.mrf.mxu3 }
 0x1b0   : > { %v787_v5 = vadd.f32 %v1612_v23, %v786_v54 }
 0x1e4   : > { %v792_v63 = vpop.permute.xlu0 %791 }
 0x1e5   : > { %v802_v19 = vpop.permute.xlu2 %801  ;;  %v869_v36 = vmul.f32 %v792_v63, %v742_v33 }
 0x1e6   : > { %v871_v56 = vmul.f32 %v802_v19, %v748_v41 }
 0x1e7   : > { %886 = vst.msk [vmem:[%s1621_s28] sm:$0xff] %vm885_vm1, %v869_v36 }
 0x1e8   : > { %888 = vst.msk [vmem:[%s1621_s28 + $0x10] sm:$0xff] %vm885_vm1, %v871_v56 }
 0x1ed   : > { %v797_v35 = vpop.permute.xlu1 %796  ;;  %v812_v50 = vpop.permute.xlu2 %811 }
 0x1ee   : > { %v870_v39 = vmul.f32 %v797_v35, %v745_v48  ;;  %v873_v53 = vmul.f32 %v812_v50, %v754_v49 }
 0x1f0   : > { %887 = vst.msk [vmem:[%s1621_s28 + $0x8] sm:$0xff] %vm885_vm1, %v870_v39 }
 0x1f1   : > { %890 = vst.msk [vmem:[%s1621_s28 + $0x20] sm:$0xff] %vm885_vm1, %v873_v53 }
 0x1f5   : > { %v807_v10 = vpop.permute.xlu1 %806  ;;  %v827_v51 = vpop.permute.xlu2 %826 }
 0x1f6   : > { %v872_v0 = vmul.f32 %v807_v10, %v751_v1  ;;  %v876_v13 = vmul.f32 %v827_v51, %v763_v40 }
 0x1f8   : > { %889 = vst.msk [vmem:[%s1621_s28 + $0x18] sm:$0xff] %vm885_vm1, %v872_v0 }
 0x1f9   : > { %893 = vst.msk [vmem:[%s1621_s28 + $0x38] sm:$0xff] %vm885_vm1, %v876_v13 }
 0x1fd   : > { %v822_v55 = vpop.permute.xlu1 %821  ;;  %v842_v29 = vpop.permute.xlu2 %841 }
 0x1fe   : > { %v875_v44 = vmul.f32 %v822_v55, %v760_v20  ;;  %v879_v42 = vmul.f32 %v842_v29, %v772_v18 }
 0x200   : > { %892 = vst.msk [vmem:[%s1621_s28 + $0x30] sm:$0xff] %vm885_vm1, %v875_v44 }
 0x201   : > { %896 = vst.msk [vmem:[%s1621_s28 + $0x50] sm:$0xff] %vm885_vm1, %v879_v42 }
 0x205   : > { %v837_v21 = vpop.permute.xlu1 %836  ;;  %v857_v26 = vpop.permute.xlu2 %856 }
 0x206   : > { %v878_v37 = vmul.f32 %v837_v21, %v769_v59  ;;  %v882_v46 = vmul.f32 %v857_v26, %v781_v58  ;;  %v817_v8 = vpop.permute.xlu0 %816 }
 0x207   : > { %v874_v61 = vmul.f32 %v817_v8, %v757_v2 }
 0x208   : > { %895 = vst.msk [vmem:[%s1621_s28 + $0x48] sm:$0xff] %vm885_vm1, %v878_v37 }
 0x209   : > { %899 = vst.msk [vmem:[%s1621_s28 + $0x68] sm:$0xff] %vm885_vm1, %v882_v46 }
 0x20a   : > { %891 = vst.msk [vmem:[%s1621_s28 + $0x28] sm:$0xff] %vm885_vm1, %v874_v61 }
 0x20d   : > { %v852_v3 = vpop.permute.xlu1 %851 }
 0x20e   : > { %v881_v14 = vmul.f32 %v852_v3, %v778_v9 }
 0x210   : > { %898 = vst.msk [vmem:[%s1621_s28 + $0x60] sm:$0xff] %vm885_vm1, %v881_v14 }
 0x211   : > { %v832_v52 = vpop.permute.xlu0 %831 }
 0x212   : > { %v877_v22 = vmul.f32 %v832_v52, %v766_v7 }
 0x214   : > { %894 = vst.msk [vmem:[%s1621_s28 + $0x40] sm:$0xff] %vm885_vm1, %v877_v22 }
 0x215   : > { %v867_v45 = vpop.permute.xlu1 %866 }
 0x216   : > { %v884_v62 = vmul.f32 %v867_v45, %v787_v5 }
 0x218   : > { %901 = vst.msk [vmem:[%s1621_s28 + $0x78] sm:$0xff] %vm885_vm1, %v884_v62 }
 0x219   : > { %v847_v24 = vpop.permute.xlu0 %846 }
 0x21a   : > { %v880_v25 = vmul.f32 %v847_v24, %v775_v43 }
 0x21c   : > { %897 = vst.msk [vmem:[%s1621_s28 + $0x58] sm:$0xff] %vm885_vm1, %v880_v25 }
 0x221   : > { %v862_v47 = vpop.permute.xlu0 %861 }
 0x222   : > { %v883_v28 = vmul.f32 %v862_v47, %v784_v15 }
 0x224   : > { %900 = vst.msk [vmem:[%s1621_s28 + $0x70] sm:$0xff] %vm885_vm1, %v883_v28 }
 0x225 PF: > { %s13_s12 = sadd.s32 1, %s1058_s12  }
 0x226   : > { %p10_p4 = scmp.ge.s32.totalorder %s13_s12, 4  }
 0x228   :  { %12 = sbr.rel (!%p10_p4) target bundleno = 1 (0x1), region = 62 }

</bundles_post_ra>
